<compile_context>
chip_gen: v6e
topology: v6e:2x2x1
jax: 0.10.0
libtpu: 0.0.40
codegen_flags: <defaults>
</compile_context>

<pallas_src>
import jax
import jax.numpy as jnp
from jax.experimental import pallas as pl
from jax.experimental.pallas import tpu as pltpu


def _copy_kernel(x_ref, o_ref):
    # identity copy of one lane-dense tile
    o_ref[...] = x_ref[...]


def _choose_layout(n, itemsize):
    """Pick (lane_width, rows, tile_rows) for a lane-dense tiled memcpy."""
    # Widest multiple of 128 that divides n -> unmasked, wide vector stores.
    lane = 128
    for cand in (8192, 4096, 2048, 1024, 512, 256, 128):
        if n % cand == 0:
            lane = cand
            break
    rows = n // lane

    # ~2 MiB per tile buffer: with default double-buffering of input+output
    # that is ~8 MiB of scoped VMEM -- safe on v5e (16 MiB scoped default),
    # v6e and v7x (32 MiB), and large enough to amortize the ~0.35 us
    # per-grid-step overhead.
    target_bytes = 2 * 1024 * 1024
    budget_rows = max(8, (target_bytes // (lane * itemsize)) // 8 * 8)

    if rows <= budget_rows:
        # Single block covering the full row extent (always legal).
        return lane, rows, rows

    # Prefer the largest multiple-of-8 divisor of `rows` within budget so the
    # grid tiles evenly (no masked trailing block).
    tile_r = 0
    for cand in range(budget_rows, 7, -8):
        if rows % cand == 0:
            tile_r = cand
            break
    if tile_r == 0:
        tile_r = budget_rows  # uneven tail handled by Pallas (cdiv grid)
    return lane, rows, tile_r


def squeeze_pallas(x):
    """Equivalent of torch.Tensor.squeeze(): removes every dim of size 1."""
    squeezed_shape = tuple(d for d in x.shape if d != 1)
    n = x.size
    itemsize = jnp.dtype(x.dtype).itemsize

    # Squeeze needs no data movement; only use the Pallas copy kernel when
    # the flat size tiles cleanly into (8,128)-aligned lane-dense blocks.
    if n == 0 or n % 128 != 0:
        return jnp.reshape(x, squeezed_shape)

    lane, rows, tile_r = _choose_layout(n, itemsize)
    flat_shape = (rows, lane)
    x2 = jnp.reshape(x, flat_shape)

    out2 = pl.pallas_call(
        _copy_kernel,
        out_shape=jax.ShapeDtypeStruct(flat_shape, x.dtype),
        grid=(pl.cdiv(rows, tile_r),),
        in_specs=[pl.BlockSpec((tile_r, lane), lambda i: (i, 0))],
        out_specs=pl.BlockSpec((tile_r, lane), lambda i: (i, 0)),
        input_output_aliases={0: 0},  # reuse the input HBM buffer
        compiler_params=pltpu.CompilerParams(
            dimension_semantics=("parallel",)),  # shard across v7x's 2 TCs
        cost_estimate=pl.CostEstimate(
            flops=0, transcendentals=0, bytes_accessed=2 * n * itemsize),
    )(x2)

    return jnp.reshape(out2, squeezed_shape)


if __name__ == "__main__":
    key = jax.random.PRNGKey(0)

    # 1) NCHW input with a size-1 channel dim (kernel path, single block).
    x1 = jax.random.normal(key, (2, 1, 16, 16), dtype=jnp.float32)
    o1 = jax.block_until_ready(squeeze_pallas(x1))
    assert o1.shape == (2, 16, 16), o1.shape
    assert jnp.allclose(o1, jnp.reshape(x1, (2, 16, 16))), "value mismatch (1)"

    # 2) Larger input exercising the multi-step tiled grid (16 MiB copy).
    k2 = jax.random.PRNGKey(1)
    x2 = jax.random.normal(k2, (16, 1, 512, 512), dtype=jnp.float32)
    o2 = jax.block_until_ready(squeeze_pallas(x2))
    assert o2.shape == (16, 512, 512), o2.shape
    assert jnp.allclose(o2, jnp.reshape(x2, (16, 512, 512))), "value mismatch (2)"

    # 3) Odd size -> pure-reshape fallback path (no masked stores).
    k3 = jax.random.PRNGKey(2)
    x3 = jax.random.normal(k3, (3, 1, 5, 7), dtype=jnp.float32)
    o3 = jax.block_until_ready(squeeze_pallas(x3))
    assert o3.shape == (3, 5, 7), o3.shape
    assert jnp.allclose(o3, jnp.reshape(x3, (3, 5, 7))), "value mismatch (3)"

    print("KERNEL_OK")
</pallas_src>

<mosaic_0001>
module attributes {stable_mosaic.version = 11 : i64} {
  func.func @_copy_kernel(%arg0: i32, %arg1: memref<1x512xf32, #tpu.memory_space<vmem>>, %arg2: memref<1x512xf32, #tpu.memory_space<vmem>>) attributes {dimension_semantics = [#tpu.dimension_semantics<parallel>], iteration_bounds = array<i64: 1>, scalar_prefetch = 0 : i64, scratch_operands = 0 : i64, tpu.core_type = #tpu.core_type<tc>, window_params = [{transform_indices = @transform_0, window_bounds = array<i64: 1, 512>}, {transform_indices = @transform_1, window_bounds = array<i64: 1, 512>}]} {
    %c0 = arith.constant 0 : index
    %c0_0 = arith.constant 0 : index
    %0 = vector.load %arg1[%c0, %c0_0] : memref<1x512xf32, #tpu.memory_space<vmem>>, vector<1x512xf32>
    %c0_1 = arith.constant 0 : index
    %c0_2 = arith.constant 0 : index
    %1 = vector.load %arg2[%c0_1, %c0_2] : memref<1x512xf32, #tpu.memory_space<vmem>>, vector<1x512xf32>
    tpu.vector_store %arg2[%c0_1, %c0_2], %0 {strides = array<i32>} : memref<1x512xf32, #tpu.memory_space<vmem>>, vector<1x512xf32>,
    return
  }
  func.func @transform_0(%arg0: i32) -> (i32, i32) {
    %c0_i32 = arith.constant 0 : i32
    %c0_i32_0 = arith.constant 0 : i32
    return %arg0, %c0_i32 : i32, i32
  }
  func.func @transform_1(%arg0: i32) -> (i32, i32) {
    %c0_i32 = arith.constant 0 : i32
    %c0_i32_0 = arith.constant 0 : i32
    return %arg0, %c0_i32 : i32, i32
  }
}

</mosaic_0001>

<bundles_post_ra>
// kernel: tpu_custom_call.1
= control target key start
LH: loop header
LB: loop body
LE: loop exit
PB: predicated region body
PF: predicated region fallthrough
CT: control target
= control target key end

     0   :  { %6 = vsyncpa [#allocation3], 0  ;;  %s106_s0 = inlined_call_operand.hbm [shape: f32[1,512], index: 0, kind: input, shape index: {}, may-alias: {0,1}]   ;;  %s107_s1 = inlined_call_operand.hbm [shape: f32[1,512], index: 1, kind: output, shape index: {}, may-alias: {0,1}]  }
   0x1   :  { %7 = vsyncpa [#allocation4], 0  ;;  %s88_s6 = smov [#allocation2]  }
   0x2   :  { %s14_s7 = sshll.u32 %s88_s6, 4  ;;  %s15_s7 = int_to_ptr.vmem [resolvable:$true] %s14_s7 }
   0x3   :  { %s52_s8 = scalar_lea.vmem %s15_s7, 64  ;;  %p57_p1 = scmp.lt.s32.totalorder %s15_s7, %s15_s7 }
   0x4   :  { %p53_p0 = scmp.ne.s32.totalorder %s15_s7, %s52_s8  ;;  %p58_p2 = scmp.lt.s32.totalorder %s52_s8, %s52_s8 }
   0x6   :  { %p59_p3 = por %p58_p2, %p57_p1 }
   0x8   :  { %p60_p4 = pnand %p59_p3, %p53_p0 }
   0xa   :  { %63 = shalt.err (!%p60_p4)
}
   0xb   :  { %17 = dma.hbm_to_vmem [thread:$0]  %s106_s0, 64, %s15_s7, [#allocation3]  }
   0xc   :  { %84 = dma.done.wait [#allocation3], 64  }
   0xd   :  { %85 = vsyncadd [#allocation3], 4294967232  ;;  %v22_v0 = vlaneseq  ;;  %s89_s11 = smov [#allocation5]   ;;  %v21_v1 = vld [vmem:[#allocation2] sm:$0xf] }
   0xe   :  { %s33_s12 = sshll.u32 %s89_s11, 4  ;;  %s34_s12 = int_to_ptr.vmem [resolvable:$true] %s33_s12 }
   0xf   :  { %vm24_vm0 = vcmp.lt.s32.totalorder %v22_v0, 512  ;;  %s64_s13 = scalar_lea.vmem %s34_s12, 64  ;;  %p69_p6 = scmp.lt.s32.totalorder %s34_s12, %s34_s12 }
  0x10   :  { %26 = vst.msk [vmem:[#allocation5] sm:$0xf] %vm24_vm0, %v21_v1  ;;  %p65_p5 = scmp.ne.s32.totalorder %s34_s12, %s64_s13  ;;  %p70_p7 = scmp.lt.s32.totalorder %s64_s13, %s64_s13 }
  0x12   :  { %p71_p8 = por %p70_p7, %p69_p6 }
  0x14   :  { %p72_p9 = pnand %p71_p8, %p65_p5 }
  0x16   :  { %75 = shalt.err (!%p72_p9)
}
  0x17   :  { %36 = dma.vmem_to_hbm [thread:$0]  %s34_s12, 64, %s107_s1, [#allocation4]  }
  0x18   :  { %86 = dma.done.wait [#allocation4], 64  }
  0x19   :  { %87 = vsyncadd [#allocation4], 4294967232 }
  0x1a   :  { %40 = vsyncpa [#allocation3], 1 }
  0x1b   :  { %41 = vsyncpa [#allocation4], 1 }

</bundles_post_ra>
